<compile_context>
chip_gen: v6e
topology: v6e:2x2x1
jax: 0.10.0
libtpu: 0.0.40
codegen_flags: <defaults>
</compile_context>

<pallas_src>
import functools

import jax
import jax.numpy as jnp
from jax.experimental import pallas as pl
from jax.experimental.pallas import tpu as pltpu


LANE = 128
SUBLANE = 8          # x / out stream as f32 -> 8-row sublane granule
TB_TARGET = 512      # batch tile target (mem-bound tiles: 512 ~ 85% of HBM roofline)


def _round_up(x, m):
    return ((x + m - 1) // m) * m


def _leaky_relu(x, negative_slope=0.01):
    # Kept in f32 (dot already produces f32 via preferred_element_type).
    return jnp.where(x >= 0, x, negative_slope * x)


def mlp_kernel(x_ref,
               w1_ref, b1_ref,
               w2_ref, b2_ref,
               w3_ref, b3_ref,
               w4_ref, b4_ref,
               o_ref):
    # Weights/biases are VMEM-resident (constant index_map -> fetched once);
    # only the x / out batch tiles stream per grid step.  x arrives f32
    # straight from HBM; cast to bf16 in-register before the MXU dot.
    # f32 accumulation, f32 bias-add + LeakyReLU (v5e VPU has no bf16
    # elementwise).
    h = jnp.dot(x_ref[...].astype(jnp.bfloat16), w1_ref[...],
                preferred_element_type=jnp.float32)
    h = _leaky_relu(h + b1_ref[...])

    h = jnp.dot(h.astype(jnp.bfloat16), w2_ref[...],
                preferred_element_type=jnp.float32)
    h = _leaky_relu(h + b2_ref[...])

    h = jnp.dot(h.astype(jnp.bfloat16), w3_ref[...],
                preferred_element_type=jnp.float32)
    h = _leaky_relu(h + b3_ref[...])

    out = jnp.dot(h.astype(jnp.bfloat16), w4_ref[...],
                  preferred_element_type=jnp.float32)
    o_ref[...] = (out + b4_ref[...]).astype(o_ref.dtype)


def _choose_tb(batch):
    tb = min(TB_TARGET, _round_up(batch, SUBLANE))
    # v7x has 2 TensorCores; a single grid step leaves one idle.  For batches
    # big enough to split usefully, cap the tile so the "parallel" batch axis
    # has >= 2 steps.
    if batch >= 128 and pl.cdiv(batch, tb) == 1:
        tb = _round_up(pl.cdiv(batch, 2), SUBLANE)
    return tb


@functools.partial(jax.jit, static_argnames=("output_dim",))
def deep_classifier_forward(x, params, output_dim=10):
    """x: (B, input_dim) float32. params: dict of bf16 weights / f32 biases
    (narrow dims already zero-padded to 128). Returns (B, output_dim) f32."""
    B, input_dim = x.shape

    w1, b1 = params["w1"], params["b1"]
    w2, b2 = params["w2"], params["b2"]
    w3, b3 = params["w3"], params["b3"]
    w4, b4 = params["w4"], params["b4"]
    out_pad = w4.shape[1]  # lane-dense padded logits width (128)

    tb = _choose_tb(B)
    grid = (pl.cdiv(B, tb),)   # partial final block instead of padding B

    def batch_map(i):
        return (i, 0)

    def const_map(i):
        return (0, 0)

    in_specs = [
        pl.BlockSpec((tb, input_dim), batch_map),
        pl.BlockSpec(w1.shape, const_map), pl.BlockSpec(b1.shape, const_map),
        pl.BlockSpec(w2.shape, const_map), pl.BlockSpec(b2.shape, const_map),
        pl.BlockSpec(w3.shape, const_map), pl.BlockSpec(b3.shape, const_map),
        pl.BlockSpec(w4.shape, const_map), pl.BlockSpec(b4.shape, const_map),
    ]
    out_spec = pl.BlockSpec((tb, out_pad), batch_map)

    padded_logits = pl.pallas_call(
        mlp_kernel,
        out_shape=jax.ShapeDtypeStruct((B, out_pad), jnp.float32),
        grid=grid,
        in_specs=in_specs,
        out_specs=out_spec,
        compiler_params=pltpu.CompilerParams(
            dimension_semantics=("parallel",),   # shard batch across TCs on v7x
            vmem_limit_bytes=16 << 20,
        ),
    )(x, w1, b1, w2, b2, w3, b3, w4, b4)

    return padded_logits[:, :output_dim]


def init_params(key, input_dim=784, output_dim=10):
    """Parameter init mirroring nn.Linear defaults, stored kernel-friendly:
    weights as (in_features, out_features) bf16, biases (1, out_features) f32.
    Narrow layer dims (32, 10) are zero-padded to 128 for lane-dense tiles;
    the zero padding contributes exact zeros so the math is unchanged."""
    dims = [(input_dim, 512), (512, 128), (128, 32), (32, output_dim)]
    pad_out = {3: LANE, 4: LANE}  # pad output cols of layers 3, 4 to 128
    pad_in = {4: LANE}            # pad input rows of layer 4 to 128
    params = {}
    for idx, (din, dout) in enumerate(dims, start=1):
        key, kw, kb = jax.random.split(key, 3)
        bound = 1.0 / (din ** 0.5)  # nn.Linear default init scheme
        w = jax.random.uniform(kw, (din, dout), jnp.float32,
                               minval=-bound, maxval=bound)
        b = jax.random.uniform(kb, (1, dout), jnp.float32,
                               minval=-bound, maxval=bound)
        din_p = pad_in.get(idx, din)
        dout_p = pad_out.get(idx, dout)
        if (din_p, dout_p) != (din, dout):
            w = jnp.pad(w, ((0, din_p - din), (0, dout_p - dout)))
            b = jnp.pad(b, ((0, 0), (0, dout_p - dout)))
        params[f"w{idx}"] = w.astype(jnp.bfloat16)
        params[f"b{idx}"] = b  # f32
    return params


def _reference_forward(x, params, output_dim=10):
    """Pure-JAX reference with the same precision recipe as the kernel."""
    h = x.astype(jnp.bfloat16)
    for i in range(1, 4):
        h = jnp.dot(h, params[f"w{i}"],
                    preferred_element_type=jnp.float32) + params[f"b{i}"]
        h = jnp.where(h >= 0, h, 0.01 * h)
        h = h.astype(jnp.bfloat16)
    out = jnp.dot(h, params["w4"],
                  preferred_element_type=jnp.float32) + params["b4"]
    return out[:, :output_dim]


if __name__ == "__main__":
    key = jax.random.PRNGKey(0)
    key, kx = jax.random.split(key)

    batch, input_dim, output_dim = 8, 784, 10
    x = jax.random.normal(kx, (batch, input_dim), jnp.float32)
    params = init_params(key, input_dim=input_dim, output_dim=output_dim)

    out = deep_classifier_forward(x, params, output_dim=output_dim)
    out = jax.block_until_ready(out)

    ref = _reference_forward(x, params, output_dim=output_dim)
    assert out.shape == (batch, output_dim)
    assert jnp.allclose(out, ref, atol=1e-2, rtol=1e-2), "mismatch vs reference"

    print("KERNEL_OK")
</pallas_src>

<mosaic_0001>
module attributes {stable_mosaic.version = 11 : i64} {
  func.func @mlp_kernel(%arg0: i32, %arg1: memref<8x784xf32, #tpu.memory_space<vmem>>, %arg2: memref<784x512xbf16, #tpu.memory_space<vmem>>, %arg3: memref<1x512xf32, #tpu.memory_space<vmem>>, %arg4: memref<512x128xbf16, #tpu.memory_space<vmem>>, %arg5: memref<1x128xf32, #tpu.memory_space<vmem>>, %arg6: memref<128x128xbf16, #tpu.memory_space<vmem>>, %arg7: memref<1x128xf32, #tpu.memory_space<vmem>>, %arg8: memref<128x128xbf16, #tpu.memory_space<vmem>>, %arg9: memref<1x128xf32, #tpu.memory_space<vmem>>, %arg10: memref<8x128xf32, #tpu.memory_space<vmem>>) attributes {dimension_semantics = [#tpu.dimension_semantics<parallel>], iteration_bounds = array<i64: 1>, scalar_prefetch = 0 : i64, scratch_operands = 0 : i64, tpu.core_type = #tpu.core_type<tc>, window_params = [{transform_indices = @transform_0, window_bounds = array<i64: 8, 784>}, {pipeline_mode = #tpu.pipeline_mode<synchronous>, transform_indices = @transform_1, window_bounds = array<i64: 784, 512>}, {pipeline_mode = #tpu.pipeline_mode<synchronous>, transform_indices = @transform_2, window_bounds = array<i64: 1, 512>}, {pipeline_mode = #tpu.pipeline_mode<synchronous>, transform_indices = @transform_3, window_bounds = array<i64: 512, 128>}, {pipeline_mode = #tpu.pipeline_mode<synchronous>, transform_indices = @transform_4, window_bounds = array<i64: 1, 128>}, {pipeline_mode = #tpu.pipeline_mode<synchronous>, transform_indices = @transform_5, window_bounds = array<i64: 128, 128>}, {pipeline_mode = #tpu.pipeline_mode<synchronous>, transform_indices = @transform_6, window_bounds = array<i64: 1, 128>}, {pipeline_mode = #tpu.pipeline_mode<synchronous>, transform_indices = @transform_7, window_bounds = array<i64: 128, 128>}, {pipeline_mode = #tpu.pipeline_mode<synchronous>, transform_indices = @transform_8, window_bounds = array<i64: 1, 128>}, {transform_indices = @transform_9, window_bounds = array<i64: 8, 128>}]} {
    %c0 = arith.constant 0 : index
    %c0_0 = arith.constant 0 : index
    %0 = vector.load %arg1[%c0, %c0_0] : memref<8x784xf32, #tpu.memory_space<vmem>>, vector<8x784xf32>
    %1 = arith.truncf %0 : vector<8x784xf32> to vector<8x784xbf16>
    %c0_1 = arith.constant 0 : index
    %c0_2 = arith.constant 0 : index
    %2 = vector.load %arg2[%c0_1, %c0_2] : memref<784x512xbf16, #tpu.memory_space<vmem>>, vector<784x512xbf16>
    %cst = arith.constant dense<0.000000e+00> : vector<8x512xf32>
    %3 = tpu.matmul %1, %2, %cst {dimension_numbers = #tpu.dot_dimension_numbers<[1], [0], [0], [1], [0, 0, 1, 1], [], []>} : vector<8x784xbf16>, vector<784x512xbf16>, vector<8x512xf32> -> vector<8x512xf32>
    %c0_3 = arith.constant 0 : index
    %c0_4 = arith.constant 0 : index
    %4 = vector.load %arg3[%c0_3, %c0_4] : memref<1x512xf32, #tpu.memory_space<vmem>>, vector<1x512xf32>
    %5 = vector.broadcast %4 : vector<1x512xf32> to vector<8x512xf32>
    %6 = arith.addf %3, %5 : vector<8x512xf32>
    %cst_5 = arith.constant 0.000000e+00 : f32
    %7 = vector.broadcast %cst_5 : f32 to vector<8x512xf32>
    %8 = arith.cmpf oge, %6, %7 : vector<8x512xf32>
    %cst_6 = arith.constant 0.00999999977 : f32
    %9 = vector.broadcast %cst_6 : f32 to vector<8x512xf32>
    %10 = arith.mulf %9, %6 : vector<8x512xf32>
    %11 = arith.select %8, %6, %10 : vector<8x512xi1>, vector<8x512xf32>
    %12 = arith.truncf %11 : vector<8x512xf32> to vector<8x512xbf16>
    %c0_7 = arith.constant 0 : index
    %c0_8 = arith.constant 0 : index
    %13 = vector.load %arg4[%c0_7, %c0_8] : memref<512x128xbf16, #tpu.memory_space<vmem>>, vector<512x128xbf16>
    %cst_9 = arith.constant dense<0.000000e+00> : vector<8x128xf32>
    %14 = tpu.matmul %12, %13, %cst_9 {dimension_numbers = #tpu.dot_dimension_numbers<[1], [0], [0], [1], [0, 0, 1, 1], [], []>} : vector<8x512xbf16>, vector<512x128xbf16>, vector<8x128xf32> -> vector<8x128xf32>
    %c0_10 = arith.constant 0 : index
    %c0_11 = arith.constant 0 : index
    %15 = vector.load %arg5[%c0_10, %c0_11] : memref<1x128xf32, #tpu.memory_space<vmem>>, vector<1x128xf32>
    %16 = vector.broadcast %15 : vector<1x128xf32> to vector<8x128xf32>
    %17 = arith.addf %14, %16 : vector<8x128xf32>
    %cst_12 = arith.constant 0.000000e+00 : f32
    %18 = vector.broadcast %cst_12 : f32 to vector<8x128xf32>
    %19 = arith.cmpf oge, %17, %18 : vector<8x128xf32>
    %cst_13 = arith.constant 0.00999999977 : f32
    %20 = vector.broadcast %cst_13 : f32 to vector<8x128xf32>
    %21 = arith.mulf %20, %17 : vector<8x128xf32>
    %22 = arith.select %19, %17, %21 : vector<8x128xi1>, vector<8x128xf32>
    %23 = arith.truncf %22 : vector<8x128xf32> to vector<8x128xbf16>
    %c0_14 = arith.constant 0 : index
    %c0_15 = arith.constant 0 : index
    %24 = vector.load %arg6[%c0_14, %c0_15] : memref<128x128xbf16, #tpu.memory_space<vmem>>, vector<128x128xbf16>
    %cst_16 = arith.constant dense<0.000000e+00> : vector<8x128xf32>
    %25 = tpu.matmul %23, %24, %cst_16 {dimension_numbers = #tpu.dot_dimension_numbers<[1], [0], [0], [1], [0, 0, 1, 1], [], []>} : vector<8x128xbf16>, vector<128x128xbf16>, vector<8x128xf32> -> vector<8x128xf32>
    %c0_17 = arith.constant 0 : index
    %c0_18 = arith.constant 0 : index
    %26 = vector.load %arg7[%c0_17, %c0_18] : memref<1x128xf32, #tpu.memory_space<vmem>>, vector<1x128xf32>
    %27 = vector.broadcast %26 : vector<1x128xf32> to vector<8x128xf32>
    %28 = arith.addf %25, %27 : vector<8x128xf32>
    %cst_19 = arith.constant 0.000000e+00 : f32
    %29 = vector.broadcast %cst_19 : f32 to vector<8x128xf32>
    %30 = arith.cmpf oge, %28, %29 : vector<8x128xf32>
    %cst_20 = arith.constant 0.00999999977 : f32
    %31 = vector.broadcast %cst_20 : f32 to vector<8x128xf32>
    %32 = arith.mulf %31, %28 : vector<8x128xf32>
    %33 = arith.select %30, %28, %32 : vector<8x128xi1>, vector<8x128xf32>
    %34 = arith.truncf %33 : vector<8x128xf32> to vector<8x128xbf16>
    %c0_21 = arith.constant 0 : index
    %c0_22 = arith.constant 0 : index
    %35 = vector.load %arg8[%c0_21, %c0_22] : memref<128x128xbf16, #tpu.memory_space<vmem>>, vector<128x128xbf16>
    %cst_23 = arith.constant dense<0.000000e+00> : vector<8x128xf32>
    %36 = tpu.matmul %34, %35, %cst_23 {dimension_numbers = #tpu.dot_dimension_numbers<[1], [0], [0], [1], [0, 0, 1, 1], [], []>} : vector<8x128xbf16>, vector<128x128xbf16>, vector<8x128xf32> -> vector<8x128xf32>
    %c0_24 = arith.constant 0 : index
    %c0_25 = arith.constant 0 : index
    %37 = vector.load %arg9[%c0_24, %c0_25] : memref<1x128xf32, #tpu.memory_space<vmem>>, vector<1x128xf32>
    %38 = vector.broadcast %37 : vector<1x128xf32> to vector<8x128xf32>
    %39 = arith.addf %36, %38 : vector<8x128xf32>
    %c0_26 = arith.constant 0 : index
    %c0_27 = arith.constant 0 : index
    %40 = vector.load %arg10[%c0_26, %c0_27] : memref<8x128xf32, #tpu.memory_space<vmem>>, vector<8x128xf32>
    tpu.vector_store %arg10[%c0_26, %c0_27], %39 {strides = array<i32>} : memref<8x128xf32, #tpu.memory_space<vmem>>, vector<8x128xf32>,
    return
  }
  func.func @transform_0(%arg0: i32) -> (i32, i32) {
    %c0_i32 = arith.constant 0 : i32
    %c0_i32_0 = arith.constant 0 : i32
    return %arg0, %c0_i32 : i32, i32
  }
  func.func @transform_1(%arg0: i32) -> (i32, i32) {
    %c0_i32 = arith.constant 0 : i32
    %c0_i32_0 = arith.constant 0 : i32
    %c0_i32_1 = arith.constant 0 : i32
    return %c0_i32, %c0_i32_0 : i32, i32
  }
  func.func @transform_2(%arg0: i32) -> (i32, i32) {
    %c0_i32 = arith.constant 0 : i32
    %c0_i32_0 = arith.constant 0 : i32
    %c0_i32_1 = arith.constant 0 : i32
    return %c0_i32, %c0_i32_0 : i32, i32
  }
  func.func @transform_3(%arg0: i32) -> (i32, i32) {
    %c0_i32 = arith.constant 0 : i32
    %c0_i32_0 = arith.constant 0 : i32
    %c0_i32_1 = arith.constant 0 : i32
    return %c0_i32, %c0_i32_0 : i32, i32
  }
  func.func @transform_4(%arg0: i32) -> (i32, i32) {
    %c0_i32 = arith.constant 0 : i32
    %c0_i32_0 = arith.constant 0 : i32
    %c0_i32_1 = arith.constant 0 : i32
    return %c0_i32, %c0_i32_0 : i32, i32
  }
  func.func @transform_5(%arg0: i32) -> (i32, i32) {
    %c0_i32 = arith.constant 0 : i32
    %c0_i32_0 = arith.constant 0 : i32
    %c0_i32_1 = arith.constant 0 : i32
    return %c0_i32, %c0_i32_0 : i32, i32
  }
  func.func @transform_6(%arg0: i32) -> (i32, i32) {
    %c0_i32 = arith.constant 0 : i32
    %c0_i32_0 = arith.constant 0 : i32
    %c0_i32_1 = arith.constant 0 : i32
    return %c0_i32, %c0_i32_0 : i32, i32
  }
  func.func @transform_7(%arg0: i32) -> (i32, i32) {
    %c0_i32 = arith.constant 0 : i32
    %c0_i32_0 = arith.constant 0 : i32
    %c0_i32_1 = arith.constant 0 : i32
    return %c0_i32, %c0_i32_0 : i32, i32
  }
  func.func @transform_8(%arg0: i32) -> (i32, i32) {
    %c0_i32 = arith.constant 0 : i32
    %c0_i32_0 = arith.constant 0 : i32
    %c0_i32_1 = arith.constant 0 : i32
    return %c0_i32, %c0_i32_0 : i32, i32
  }
  func.func @transform_9(%arg0: i32) -> (i32, i32) {
    %c0_i32 = arith.constant 0 : i32
    %c0_i32_0 = arith.constant 0 : i32
    return %arg0, %c0_i32 : i32, i32
  }
}

</mosaic_0001>

<bundles_post_ra>
// kernel: deep_classifier_forward.1
= control target key start
LH: loop header
LB: loop body
LE: loop exit
PB: predicated region body
PF: predicated region fallthrough
CT: control target
= control target key end

     0   :  { %14 = vsyncpa [#allocation3], 0  ;;  %s3274_s0 = inlined_call_operand.hbm [shape: f32[8,784], index: 0, kind: input, shape index: {}]   ;;  %s3275_s1 = inlined_call_operand.hbm [shape: bf16[784,512], index: 1, kind: input, shape index: {}]   ;;  %s3276_s2 = inlined_call_operand.hbm [shape: f32[1,512], index: 2, kind: input, shape index: {}]   ;;  %s3277_s3 = inlined_call_operand.hbm [shape: bf16[512,128], index: 3, kind: input, shape index: {}]   ;;  %s3278_s4 = inlined_call_operand.vmem [shape: f32[1,128], index: 4, kind: input, shape index: {}]   ;;  %s3279_s5 = inlined_call_operand.hbm [shape: bf16[128,128], index: 5, kind: input, shape index: {}]   ;;  %s3280_s6 = inlined_call_operand.vmem [shape: f32[1,128], index: 6, kind: input, shape index: {}]   ;;  %s3281_s7 = inlined_call_operand.hbm [shape: bf16[128,128], index: 7, kind: input, shape index: {}]   ;;  %s3282_s8 = inlined_call_operand.vmem [shape: f32[1,128], index: 8, kind: input, shape index: {}]   ;;  %s3283_s9 = inlined_call_operand.hbm [shape: f32[8,128], index: 9, kind: output, shape index: {}]  }
   0x1   :  { %15 = vsyncpa [#allocation6], 0 }
   0x2   :  { %16 = vsyncpa [#allocation9], 0 }
   0x3   :  { %17 = vsyncpa [#allocation12], 0 }
   0x4   :  { %18 = vsyncpa [#allocation4], 0  ;;  %s3121_s30 = smov [#allocation5]  }
   0x5   :  { %s34_s10 = sshll.u32 %s3121_s30, 4  ;;  %s35_s10 = int_to_ptr.vmem [resolvable:$true] %s34_s10 }
   0x6   :  { %s2979_s11 = scalar_lea.vmem %s35_s10, 25088  ;;  %p2984_p1 = scmp.lt.s32.totalorder %s35_s10, %s35_s10 }
   0x7   :  { %p2980_p0 = scmp.ne.s32.totalorder %s35_s10, %s2979_s11  ;;  %p2985_p2 = scmp.lt.s32.totalorder %s2979_s11, %s2979_s11 }
   0x9   :  { %p2986_p3 = por %p2985_p2, %p2984_p1 }
   0xb   :  { %p2987_p4 = pnand %p2986_p3, %p2980_p0 }
   0xd   :  { %2990 = shalt.err (!%p2987_p4)
}
   0xe   :  { %s3122_s12 = smov 256   ;;  %s3123_s13 = smov 16  }
   0xf   :  { %40 = dma.hbm_to_vmem [thread:$0]  %s3275_s1, 25088, %s35_s10, [#allocation6], %s3122_s12, %s3122_s12, %s3123_s13  }
  0x10   :  { %s3124_s16 = smov [#allocation8]  }
  0x11   :  { %s56_s17 = sshll.u32 %s3124_s16, 4  ;;  %s57_s17 = int_to_ptr.vmem [resolvable:$true] %s56_s17 }
  0x12   :  { %s2999_s18 = scalar_lea.vmem %s57_s17, 4096  ;;  %p3004_p6 = scmp.lt.s32.totalorder %s57_s17, %s57_s17 }
  0x13   :  { %p3000_p5 = scmp.ne.s32.totalorder %s57_s17, %s2999_s18  ;;  %p3005_p7 = scmp.lt.s32.totalorder %s2999_s18, %s2999_s18 }
  0x15   :  { %p3006_p8 = por %p3005_p7, %p3004_p6 }
  0x17   :  { %p3007_p9 = pnand %p3006_p8, %p3000_p5 }
  0x19   :  { %3010 = shalt.err (!%p3007_p9)
}
  0x1a   :  { %s3125_s19 = smov 64   ;;  %s3126_s20 = smov 4  }
  0x1b   :  { %62 = dma.hbm_to_vmem [thread:$0]  %s3277_s3, 4096, %s57_s17, [#allocation9], %s3125_s19, %s3125_s19, %s3126_s20  }
  0x1c   :  { %s3127_s1 = smov [#allocation2]   ;;  %s3128_s24 = smov [#allocation7]  }
  0x1d   :  { %s25_s23 = sshll.u32 %s3127_s1, 4  ;;  %s47_s25 = sshll.u32 %s3128_s24, 4  ;;  %s26_s23 = int_to_ptr.vmem [resolvable:$true] %s25_s23  ;;  %s48_s25 = int_to_ptr.vmem [resolvable:$true] %s47_s25 }
  0x1e   :  { %s3019_s26 = scalar_lea.vmem %s26_s23, 896  ;;  %p3024_p11 = scmp.lt.s32.totalorder %s26_s23, %s26_s23 }
  0x1f   :  { %p3020_p10 = scmp.ne.s32.totalorder %s26_s23, %s3019_s26  ;;  %p3025_p12 = scmp.lt.s32.totalorder %s3019_s26, %s3019_s26 }
  0x21   :  { %p3026_p13 = por %p3025_p12, %p3024_p11 }
  0x23   :  { %p3027_p0 = pnand %p3026_p13, %p3020_p10 }
  0x25   :  { %3030 = shalt.err (!%p3027_p0)
}
  0x26   :  { %28 = dma.hbm_to_vmem [thread:$0]  %s3274_s0, 896, %s26_s23, [#allocation3]  }
  0x27   :  { %s3039_s29 = scalar_lea.vmem %s48_s25, 64  ;;  %p3044_p2 = scmp.lt.s32.totalorder %s48_s25, %s48_s25 }
  0x28   :  { %p3040_p1 = scmp.ne.s32.totalorder %s48_s25, %s3039_s29  ;;  %p3045_p3 = scmp.lt.s32.totalorder %s3039_s29, %s3039_s29 }
  0x2a   :  { %p3046_p4 = por %p3045_p3, %p3044_p2 }
  0x2c   :  { %p3047_p5 = pnand %p3046_p4, %p3040_p1 }
  0x2e   :  { %3050 = shalt.err (!%p3047_p5)
}
  0x2f   :  { %50 = dma.hbm_to_vmem [thread:$0]  %s3276_s2, 64, %s48_s25, [#allocation6]  }
  0x30   :  { %s3129_s10 = smov [#allocation10]   ;;  %s3130_s12 = smov [#allocation11]  }
  0x31   :  { %s70_s11 = sshll.u32 %s3129_s10, 4  ;;  %s84_s13 = sshll.u32 %s3130_s12, 4  ;;  %s71_s11 = int_to_ptr.vmem [resolvable:$true] %s70_s11  ;;  %s85_s13 = int_to_ptr.vmem [resolvable:$true] %s84_s13 }
  0x32   :  { %s3059_s14 = scalar_lea.vmem %s71_s11, 1024  ;;  %p3064_p7 = scmp.lt.s32.totalorder %s71_s11, %s71_s11 }
  0x33   :  { %p3060_p6 = scmp.ne.s32.totalorder %s71_s11, %s3059_s14  ;;  %p3065_p8 = scmp.lt.s32.totalorder %s3059_s14, %s3059_s14 }
  0x35   :  { %p3066_p9 = por %p3065_p8, %p3064_p7 }
  0x37   :  { %p3067_p10 = pnand %p3066_p9, %p3060_p6 }
  0x39   :  { %3070 = shalt.err (!%p3067_p10)
}
  0x3a   :  { %76 = dma.hbm_to_vmem [thread:$0]  %s3279_s5, 1024, %s71_s11, [#allocation9], %s3125_s19, %s3125_s19, %s3126_s20  }
  0x3b   :  { %s3079_s2 = scalar_lea.vmem %s85_s13, 1024  ;;  %p3084_p12 = scmp.lt.s32.totalorder %s85_s13, %s85_s13 }
  0x3c   :  { %p3080_p11 = scmp.ne.s32.totalorder %s85_s13, %s3079_s2  ;;  %p3085_p13 = scmp.lt.s32.totalorder %s3079_s2, %s3079_s2 }
  0x3e   :  { %p3086_p0 = por %p3085_p13, %p3084_p12 }
  0x40   :  { %p3087_p1 = pnand %p3086_p0, %p3080_p11 }
  0x42   :  { %3090 = shalt.err (!%p3087_p1)
}
  0x43   :  { %90 = dma.hbm_to_vmem [thread:$0]  %s3281_s7, 1024, %s85_s13, [#allocation12], %s3125_s19, %s3125_s19, %s3126_s20  }
  0x44   :  { %3111 = dma.done.wait [#allocation3], 896  }
  0x45   :  { %3112 = vsyncadd [#allocation3], 4294966400 }
  0x46   :  { %3113 = dma.done.wait [#allocation6], 25152  }
  0x47   :  { %3114 = vsyncadd [#allocation6], 4294942144 }
  0x48   :  { %3115 = dma.done.wait [#allocation9], 5120  }
  0x49   :  { %3116 = vsyncadd [#allocation9], 4294962176 }
  0x4a   :  { %3117 = dma.done.wait [#allocation12], 1024  }
  0x4b   :  { %3118 = vsyncadd [#allocation12], 4294966272  ;;  %v2629_v0 = vld [vmem:[#allocation5 + $0xe4] ss:$16 sps:$4 sm:$0xff]   ;;  %v2633_v2 = vld [vmem:[#allocation5 + $0xe0] ss:$16 sps:$4 sm:$0xff]  }
  0x4c   :  { %v2631_v1 = vld [vmem:[#allocation5 + $0x2e4] ss:$16 sps:$4 sm:$0xff]   ;;  %1328 = vmatprep.subr.bf16.mxu0 %v2629_v0  ;;  %v2634_v3 = vld [vmem:[#allocation5 + $0x2e0] ss:$16 sps:$4 sm:$0xff]   ;;  %vm1324_vm0 = vcmask 130048   ;;  %vm3133_vm5 = vmmov 0  }
  0x4d   :  { %1369 = vmatprep.subr.bf16.mxu1 %v2631_v1  ;;  %v2635_v4 = vld [vmem:[#allocation5 + $0xc4] ss:$16 sps:$4 sm:$0xff]   ;;  %1329 = vmatpush1.bf16.msra.mxu0 %v2633_v2  ;;  %v2639_v6 = vld [vmem:[#allocation5 + $0xc0] ss:$16 sps:$4 sm:$0xff]   ;;  %s3134_s21 = smov [#allocation13]  }
  0x4e   :  { %1370 = vmatpush1.bf16.msra.mxu1 %v2634_v3  ;;  %v2637_v5 = vld [vmem:[#allocation5 + $0x2c4] ss:$16 sps:$4 sm:$0xff]   ;;  %1330 = vmatprep.subr.bf16.mxu0 %v2635_v4  ;;  %v2640_v7 = vld [vmem:[#allocation5 + $0x2c0] ss:$16 sps:$4 sm:$0xff]   ;;  %v112_v4 = vld [vmem:[#allocation2] sm:$0xff]  ;;  %s2252_s22 = sshll.u32 %s3134_s21, 4  ;;  %s2253_s22 = int_to_ptr.vmem [resolvable:$true] %s2252_s22 }
  0x4f   :  { %1371 = vmatprep.subr.bf16.mxu1 %v2637_v5  ;;  %v2641_v8 = vld [vmem:[#allocation5 + $0xa4] ss:$16 sps:$4 sm:$0xff]   ;;  %v2645_v10 = vld [vmem:[#allocation5 + $0xa0] ss:$16 sps:$4 sm:$0xff]   ;;  %v114_v5 = vld [vmem:[#allocation2 + $0x10] sm:$0xff]  ;;  %p3096_p3 = scmp.lt.s32.totalorder %s2253_s22, %s2253_s22 }
  0x50   :  { %v2643_v9 = vld [vmem:[#allocation5 + $0x2a4] ss:$16 sps:$4 sm:$0xff]   ;;  %v2646_v11 = vld [vmem:[#allocation5 + $0x2a0] ss:$16 sps:$4 sm:$0xff]  }
  0x51   :  { %1331 = vmatpush1.bf16.msra.mxu0 %v2639_v6  ;;  %v2647_v12 = vld [vmem:[#allocation5 + $0x84] ss:$16 sps:$4 sm:$0xff]   ;;  %v2651_v14 = vld [vmem:[#allocation5 + $0x80] ss:$16 sps:$4 sm:$0xff]  }
  0x52   :  { %1372 = vmatpush1.bf16.msra.mxu1 %v2640_v7  ;;  %1332 = vmatprep.subr.bf16.mxu0 %v2641_v8  ;;  %v2649_v13 = vld [vmem:[#allocation5 + $0x284] ss:$16 sps:$4 sm:$0xff]   ;;  %v2652_v15 = vld [vmem:[#allocation5 + $0x280] ss:$16 sps:$4 sm:$0xff]   ;;  %v3218_v8 = vpack.c.bf16 %v112_v4, %v112_v4  ;;  %v2808_v4 = vld [vmem:[#allocation5 + $0x16c] ss:$16 sps:$4 sm:$0xff]  }
  0x53   :  { %1373 = vmatprep.subr.bf16.mxu1 %v2643_v9  ;;  %v2653_v16 = vld [vmem:[#allocation5 + $0x64] ss:$16 sps:$4 sm:$0xff]   ;;  %v2657_v18 = vld [vmem:[#allocation5 + $0x60] ss:$16 sps:$4 sm:$0xff]   ;;  %v3220_v9 = vpack.c.bf16 %v114_v5, %v114_v5 }
  0x54   :  { %v2655_v17 = vld [vmem:[#allocation5 + $0x264] ss:$16 sps:$4 sm:$0xff]   ;;  %v2658_v19 = vld [vmem:[#allocation5 + $0x260] ss:$16 sps:$4 sm:$0xff]  }
  0x55   :  { %1333 = vmatpush1.bf16.msra.mxu0 %v2645_v10  ;;  %v2659_v20 = vld [vmem:[#allocation5 + $0x44] ss:$16 sps:$4 sm:$0xff]   ;;  %v2663_v22 = vld [vmem:[#allocation5 + $0x40] ss:$16 sps:$4 sm:$0xff]  }
  0x56   :  { %1374 = vmatpush1.bf16.msra.mxu1 %v2646_v11  ;;  %1334 = vmatprep.subr.bf16.mxu0 %v2647_v12  ;;  %v2661_v21 = vld [vmem:[#allocation5 + $0x244] ss:$16 sps:$4 sm:$0xff]   ;;  %v2664_v23 = vld [vmem:[#allocation5 + $0x240] ss:$16 sps:$4 sm:$0xff]  }
  0x57   :  { %1375 = vmatprep.subr.bf16.mxu1 %v2649_v13  ;;  %v2665_v24 = vld [vmem:[#allocation5 + $0x24] ss:$16 sps:$4 sm:$0xff]   ;;  %v2669_v26 = vld [vmem:[#allocation5 + $0x20] ss:$16 sps:$4 sm:$0xff]   ;;  %v2736_v13 = vld [vmem:[#allocation5 + $0xec] ss:$16 sps:$4 sm:$0xff]  }
  0x58   :  { %v2667_v25 = vld [vmem:[#allocation5 + $0x224] ss:$16 sps:$4 sm:$0xff]   ;;  %v2670_v27 = vld [vmem:[#allocation5 + $0x220] ss:$16 sps:$4 sm:$0xff]  }
  0x59   :  { %1335 = vmatpush1.bf16.msra.mxu0 %v2651_v14  ;;  %v2671_v28 = vld [vmem:[#allocation5 + $0x4] ss:$16 sps:$4 sm:$0xff]   ;;  %v2675_v30 = vld [vmem:[#allocation5] ss:$16 sps:$4 sm:$0xff]  }
  0x5a   :  { %1376 = vmatpush1.bf16.msra.mxu1 %v2652_v15  ;;  %1336 = vmatprep.subr.bf16.mxu0 %v2653_v16  ;;  %v2673_v29 = vld [vmem:[#allocation5 + $0x204] ss:$16 sps:$4 sm:$0xff]   ;;  %v2676_v31 = vld [vmem:[#allocation5 + $0x200] ss:$16 sps:$4 sm:$0xff]   ;;  %v118_v15 = vld [vmem:[#allocation2 + $0x30] sm:$0xff]  ;;  %v3131_v16 = vmov 0  }
  0x5b   :  { %1377 = vmatprep.subr.bf16.mxu1 %v2655_v17  ;;  %v2677_v32 = vld [vmem:[#allocation5 + $0x1e4] ss:$16 sps:$4 sm:$0xff]   ;;  %v2681_v34 = vld [vmem:[#allocation5 + $0x1e0] ss:$16 sps:$4 sm:$0xff]  }
  0x5c   :  { %v2679_v33 = vld [vmem:[#allocation5 + $0x3e4] ss:$16 sps:$4 sm:$0xff]   ;;  %v2682_v35 = vld [vmem:[#allocation5 + $0x3e0] ss:$16 sps:$4 sm:$0xff]  }
  0x5d   :  { %1337 = vmatpush1.bf16.msra.mxu0 %v2657_v18  ;;  %v2683_v36 = vld [vmem:[#allocation5 + $0x1c4] ss:$16 sps:$4 sm:$0xff]   ;;  %v2687_v38 = vld [vmem:[#allocation5 + $0x1c0] ss:$16 sps:$4 sm:$0xff]   ;;  %v2734_v18 = vld [vmem:[#allocation5 + $0xe8] ss:$16 sps:$4 sm:$0xff]  }
  0x5e   :  { %1378 = vmatpush1.bf16.msra.mxu1 %v2658_v19  ;;  %1338 = vmatprep.subr.bf16.mxu0 %v2659_v20  ;;  %v2685_v37 = vld [vmem:[#allocation5 + $0x3c4] ss:$16 sps:$4 sm:$0xff]   ;;  %v2688_v39 = vld [vmem:[#allocation5 + $0x3c0] ss:$16 sps:$4 sm:$0xff]   ;;  %v3225_v19 = vpack.c.bf16 %v118_v15, %v118_v15  ;;  %v116_v15 = vld [vmem:[#allocation2 + $0x20] sm:$0xff] }
  0x5f   :  { %1379 = vmatprep.subr.bf16.mxu1 %v2661_v21  ;;  %v2689_v40 = vld [vmem:[#allocation5 + $0x1a4] ss:$16 sps:$4 sm:$0xff]   ;;  %v2693_v42 = vld [vmem:[#allocation5 + $0x1a0] ss:$16 sps:$4 sm:$0xff]   ;;  %v2742_v21 = vld [vmem:[#allocation5 + $0xcc] ss:$16 sps:$4 sm:$0xff]  }
  0x60   :  { %v2691_v41 = vld [vmem:[#allocation5 + $0x3a4] ss:$16 sps:$4 sm:$0xff]   ;;  %v2694_v43 = vld [vmem:[#allocation5 + $0x3a0] ss:$16 sps:$4 sm:$0xff]  }
  0x61   :  { %1339 = vmatpush1.bf16.msra.mxu0 %v2663_v22  ;;  %v2695_v44 = vld [vmem:[#allocation5 + $0x184] ss:$16 sps:$4 sm:$0xff]   ;;  %v2699_v47 = vld [vmem:[#allocation5 + $0x180] ss:$16 sps:$4 sm:$0xff]  }
  0x62   :  { %1380 = vmatpush1.bf16.msra.mxu1 %v2664_v23  ;;  %1340 = vmatprep.subr.bf16.mxu0 %v2665_v24  ;;  %v2697_v45 = vld [vmem:[#allocation5 + $0x384] ss:$16 sps:$4 sm:$0xff]   ;;  %v2700_v48 = vld [vmem:[#allocation5 + $0x380] ss:$16 sps:$4 sm:$0xff]   ;;  %v2740_v23 = vld [vmem:[#allocation5 + $0xc8] ss:$16 sps:$4 sm:$0xff]  }
  0x63   :  { %1381 = vmatprep.subr.bf16.mxu1 %v2667_v25  ;;  %v113_v46 = vld [vmem:[#allocation2 + $0x8] sm:$0xff]  ;;  %v115_v50 = vld [vmem:[#allocation2 + $0x18] sm:$0xff]  ;;  %v2748_v25 = vld [vmem:[#allocation5 + $0xac] ss:$16 sps:$4 sm:$0xff]  }
  0x64   :  { %v3212_v49 = vpack.c.bf16 %v113_v46, %v113_v46  ;;  %v2701_v51 = vld [vmem:[#allocation5 + $0x164] ss:$16 sps:$4 sm:$0xff]   ;;  %v3214_v52 = vpack.c.bf16 %v115_v50, %v115_v50  ;;  %v2705_v54 = vld [vmem:[#allocation5 + $0x160] ss:$16 sps:$4 sm:$0xff]  }
  0x65   :  { %1341 = vmatpush1.bf16.msra.mxu0 %v2669_v26  ;;  %v2703_v53 = vld [vmem:[#allocation5 + $0x364] ss:$16 sps:$4 sm:$0xff]   ;;  %v2706_v55 = vld [vmem:[#allocation5 + $0x360] ss:$16 sps:$4 sm:$0xff]  }
  0x66   :  { %1382 = vmatpush1.bf16.msra.mxu1 %v2670_v27  ;;  %1342 = vmatprep.subr.bf16.mxu0 %v2671_v28  ;;  %v2707_v56 = vld [vmem:[#allocation5 + $0x144] ss:$16 sps:$4 sm:$0xff]   ;;  %v2711_v58 = vld [vmem:[#allocation5 + $0x140] ss:$16 sps:$4 sm:$0xff]   ;;  %v2746_v27 = vld [vmem:[#allocation5 + $0xa8] ss:$16 sps:$4 sm:$0xff]  }
  0x67   :  { %1383 = vmatprep.subr.bf16.mxu1 %v2673_v29  ;;  %1360 = vmatprep.mubr.bf16.mxu0 %v3212_v49  ;;  %v2709_v57 = vld [vmem:[#allocation5 + $0x344] ss:$16 sps:$4 sm:$0xff]   ;;  %v2712_v59 = vld [vmem:[#allocation5 + $0x340] ss:$16 sps:$4 sm:$0xff]   ;;  %v2754_v29 = vld [vmem:[#allocation5 + $0x8c] ss:$16 sps:$4 sm:$0xff]  }
  0x68   :  { %1401 = vmatprep.mubr.bf16.mxu1 %v3214_v52  ;;  %v2713_v60 = vld [vmem:[#allocation5 + $0x124] ss:$16 sps:$4 sm:$0xff]   ;;  %v2717_v62 = vld [vmem:[#allocation5 + $0x120] ss:$16 sps:$4 sm:$0xff]  }
  0x69   :  { %1343 = vmatpush1.bf16.msra.mxu0 %v2675_v30  ;;  %v2715_v61 = vld [vmem:[#allocation5 + $0x324] ss:$16 sps:$4 sm:$0xff]   ;;  %v2718_v63 = vld [vmem:[#allocation5 + $0x320] ss:$16 sps:$4 sm:$0xff]  }
  0x6a   :  { %1384 = vmatpush1.bf16.msra.mxu1 %v2676_v31  ;;  %1344 = vmatprep.subr.bf16.mxu0 %v2677_v32  ;;  %v2719_v0 = vld [vmem:[#allocation5 + $0x104] ss:$16 sps:$4 sm:$0xff]   ;;  %v2723_v2 = vld [vmem:[#allocation5 + $0x100] ss:$16 sps:$4 sm:$0xff]   ;;  %v2752_v31 = vld [vmem:[#allocation5 + $0x88] ss:$16 sps:$4 sm:$0xff]  }
  0x6b   :  { %1385 = vmatprep.subr.bf16.mxu1 %v2679_v33  ;;  %v2721_v1 = vld [vmem:[#allocation5 + $0x304] ss:$16 sps:$4 sm:$0xff]   ;;  %v2724_v3 = vld [vmem:[#allocation5 + $0x300] ss:$16 sps:$4 sm:$0xff]   ;;  %v2760_v33 = vld [vmem:[#allocation5 + $0x6c] ss:$16 sps:$4 sm:$0xff]  }
  0x6c   :  { %v2727_v6 = vld [vmem:[#allocation5 + $0x4e4] ss:$16 sps:$4 sm:$0xff]   ;;  %v2725_v10 = vld [vmem:[#allocation5 + $0x4e0] ss:$16 sps:$4 sm:$0xff]  }
  0x6d   :  { %1345 = vmatpush2.bf16.msra.mxu0 %v2681_v34  ;;  %v2730_v7 = vld [vmem:[#allocation5 + $0x604] ss:$16 sps:$4 sm:$0xff]   ;;  %v2728_v11 = vld [vmem:[#allocation5 + $0x600] ss:$16 sps:$4 sm:$0xff]  }
  0x6e   :  { %1386 = vmatpush2.bf16.msra.mxu1 %v2682_v35  ;;  %1346 = vmatprep.subr.bf16.mxu0 %v2683_v36  ;;  %v2733_v12 = vld [vmem:[#allocation5 + $0x4c4] ss:$16 sps:$4 sm:$0xff]   ;;  %v2731_v14 = vld [vmem:[#allocation5 + $0x4c0] ss:$16 sps:$4 sm:$0xff]  }
  0x6f   :  { %1387 = vmatprep.subr.bf16.mxu1 %v2685_v37  ;;  %v2739_v17 = vld [vmem:[#allocation5 + $0x4a4] ss:$16 sps:$4 sm:$0xff]   ;;  %v2737_v20 = vld [vmem:[#allocation5 + $0x4a0] ss:$16 sps:$4 sm:$0xff]   ;;  %v2758_v37 = vld [vmem:[#allocation5 + $0x68] ss:$16 sps:$4 sm:$0xff]  }
  0x70   :  { %v2745_v22 = vld [vmem:[#allocation5 + $0x484] ss:$16 sps:$4 sm:$0xff]   ;;  %v2743_v24 = vld [vmem:[#allocation5 + $0x480] ss:$16 sps:$4 sm:$0xff]  }
  0x71   :  { %1347 = vmatpush2.bf16.msra.mxu0 %v2687_v38  ;;  %v2751_v26 = vld [vmem:[#allocation5 + $0x464] ss:$16 sps:$4 sm:$0xff]   ;;  %v2749_v28 = vld [vmem:[#allocation5 + $0x460] ss:$16 sps:$4 sm:$0xff]  }
  0x72   :  { %1388 = vmatpush2.bf16.msra.mxu1 %v2688_v39  ;;  %1348 = vmatprep.subr.bf16.mxu0 %v2689_v40  ;;  %v2757_v30 = vld [vmem:[#allocation5 + $0x444] ss:$16 sps:$4 sm:$0xff]   ;;  %v2755_v32 = vld [vmem:[#allocation5 + $0x440] ss:$16 sps:$4 sm:$0xff]   ;;  %v2766_v39 = vld [vmem:[#allocation5 + $0x4c] ss:$16 sps:$4 sm:$0xff]  }
  0x73   :  { %1389 = vmatprep.subr.bf16.mxu1 %v2691_v41  ;;  %v2763_v34 = vld [vmem:[#allocation5 + $0x424] ss:$16 sps:$4 sm:$0xff]   ;;  %v2761_v38 = vld [vmem:[#allocation5 + $0x420] ss:$16 sps:$4 sm:$0xff]   ;;  %v2764_v41 = vld [vmem:[#allocation5 + $0x48] ss:$16 sps:$4 sm:$0xff]  }
  0x74   :  { %v117_v35 = vld [vmem:[#allocation2 + $0x28] sm:$0xff] }
  0x75   :  { %1349 = vmatpush2.bf16.msra.mxu0 %v2693_v42  ;;  %v3230_v36 = vpack.c.bf16 %v117_v35, %v117_v35  ;;  %v2769_v40 = vld [vmem:[#allocation5 + $0x404] ss:$16 sps:$4 sm:$0xff]   ;;  %v2767_v42 = vld [vmem:[#allocation5 + $0x400] ss:$16 sps:$4 sm:$0xff]   ;;  %v2847_v35 = vld [vmem:[#allocation5 + $0x26c] ss:$16 sps:$4 sm:$0xff]  }
  0x76   :  { %1390 = vmatpush2.bf16.msra.mxu1 %v2694_v43  ;;  %1350 = vmatprep.subr.bf16.mxu0 %v2695_v44  ;;  %v2772_v43 = vld [vmem:[#allocation5 + $0x2c] ss:$16 sps:$4 sm:$0xff]   ;;  %v2775_v44 = vld [vmem:[#allocation5 + $0x5e4] ss:$16 sps:$4 sm:$0xff]   ;;  %v2773_v46 = vld [vmem:[#allocation5 + $0x5e0] ss:$16 sps:$4 sm:$0xff]  }
  0x77   :  { %1391 = vmatprep.subr.bf16.mxu1 %v2697_v45  ;;  %v2770_v45 = vld [vmem:[#allocation5 + $0x28] ss:$16 sps:$4 sm:$0xff]   ;;  %v2779_v50 = vld [vmem:[#allocation5 + $0x5c0] ss:$16 sps:$4 sm:$0xff]   ;;  %v2811_v5 = vld [vmem:[#allocation5 + $0x524] ss:$16 sps:$4 sm:$0xff]  }
  0x79   :  { %1351 = vmatpush2.bf16.msra.mxu0 %v2699_v47  ;;  %v2778_v47 = vld [vmem:[#allocation5 + $0xc] ss:$16 sps:$4 sm:$0xff]  }
  0x7a   :  { %1392 = vmatpush2.bf16.msra.mxu1 %v2700_v48  ;;  %1352 = vmatprep.subr.bf16.mxu0 %v2701_v51  ;;  %v2781_v48 = vld [vmem:[#allocation5 + $0x5c4] ss:$16 sps:$4 sm:$0xff]   ;;  %v2784_v51 = vld [vmem:[#allocation5 + $0x1ec] ss:$16 sps:$4 sm:$0xff]  }
  0x7b   :  { %1393 = vmatprep.subr.bf16.mxu1 %v2703_v53  ;;  %v2787_v53 = vld [vmem:[#allocation5 + $0x5a4] ss:$16 sps:$4 sm:$0xff]  }
  0x7d   :  { %1353 = vmatpush2.bf16.msra.mxu0 %v2705_v54  ;;  %v2782_v54 = vld [vmem:[#allocation5 + $0x1e8] ss:$16 sps:$4 sm:$0xff]  }
  0x7e   :  { %1394 = vmatpush2.bf16.msra.mxu1 %v2706_v55  ;;  %1354 = vmatprep.subr.bf16.mxu0 %v2707_v56  ;;  %v2785_v55 = vld [vmem:[#allocation5 + $0x5a0] ss:$16 sps:$4 sm:$0xff]   ;;  %v2790_v56 = vld [vmem:[#allocation5 + $0x1cc] ss:$16 sps:$4 sm:$0xff]  }
  0x7f   :  { %1395 = vmatprep.subr.bf16.mxu1 %v2709_v57  ;;  %v2793_v57 = vld [vmem:[#allocation5 + $0x584] ss:$16 sps:$4 sm:$0xff]  }
  0x81   :  { %1355 = vmatpush2.bf16.msra.mxu0 %v2711_v58  ;;  %v2788_v58 = vld [vmem:[#allocation5 + $0x1c8] ss:$16 sps:$4 sm:$0xff]  }
  0x82   :  { %1396 = vmatpush2.bf16.msra.mxu1 %v2712_v59  ;;  %1356 = vmatprep.subr.bf16.mxu0 %v2713_v60  ;;  %v2791_v59 = vld [vmem:[#allocation5 + $0x580] ss:$16 sps:$4 sm:$0xff]   ;;  %v2796_v60 = vld [vmem:[#allocation5 + $0x1ac] ss:$16 sps:$4 sm:$0xff]  }
  0x83   :  { %1397 = vmatprep.subr.bf16.mxu1 %v2715_v61  ;;  %v2799_v61 = vld [vmem:[#allocation5 + $0x564] ss:$16 sps:$4 sm:$0xff]  }
  0x85   :  { %1357 = vmatpush2.bf16.msra.mxu0 %v2717_v62  ;;  %v2794_v62 = vld [vmem:[#allocation5 + $0x1a8] ss:$16 sps:$4 sm:$0xff]  }
  0x86   :  { %1398 = vmatpush2.bf16.msra.mxu1 %v2718_v63  ;;  %1358 = vmatprep.subr.bf16.mxu0 %v2719_v0  ;;  %v2797_v63 = vld [vmem:[#allocation5 + $0x560] ss:$16 sps:$4 sm:$0xff]   ;;  %v2802_v0 = vld [vmem:[#allocation5 + $0x18c] ss:$16 sps:$4 sm:$0xff]  }
  0x87   :  { %1399 = vmatprep.subr.bf16.mxu1 %v2721_v1  ;;  %v2805_v1 = vld [vmem:[#allocation5 + $0x544] ss:$16 sps:$4 sm:$0xff]  }
  0x89   :  { %1359 = vmatpush2.bf16.msra.mxu0 %v2723_v2  ;;  %v2800_v2 = vld [vmem:[#allocation5 + $0x188] ss:$16 sps:$4 sm:$0xff]  }
  0x8a   :  { %1400 = vmatpush2.bf16.msra.mxu1 %v2724_v3  ;;  %1410 = vmatprep.subr.bf16.mxu0 %v2727_v6  ;;  %v2803_v3 = vld [vmem:[#allocation5 + $0x540] ss:$16 sps:$4 sm:$0xff]   ;;  %v2806_v6 = vld [vmem:[#allocation5 + $0x168] ss:$16 sps:$4 sm:$0xff]  }
  0x8b   :  { %1465 = vmatprep.subr.bf16.mxu1 %v2730_v7  ;;  %v2809_v7 = vld [vmem:[#allocation5 + $0x520] ss:$16 sps:$4 sm:$0xff]  }
  0x8c   :  { %1361 = vmatmul.mubr.bf16.vlgmr.msra.gmra.mxu0 %v3218_v8 }
  0x8d   :  { %1402 = vmatmul.mubr.bf16.vlgmr.msra.gmra.mxu1 %v3220_v9  ;;  %1411 = vmatpush1.bf16.msra.mxu0 %v2725_v10  ;;  %v2814_v10 = vld [vmem:[#allocation5 + $0x14c] ss:$16 sps:$4 sm:$0xff]  }
  0x8e   :  { %1466 = vmatpush1.bf16.msra.mxu1 %v2728_v11  ;;  %1412 = vmatprep.subr.bf16.mxu0 %v2733_v12  ;;  %v2817_v11 = vld [vmem:[#allocation5 + $0x504] ss:$16 sps:$4 sm:$0xff]   ;;  %v2812_v12 = vld [vmem:[#allocation5 + $0x148] ss:$16 sps:$4 sm:$0xff]  }
  0x8f   :  { %1483 = vmatprep.mubr.bf16.mxu1 %v3131_v16  ;;  %1492 = vmatprep.subr.bf16.mxu1 %v2736_v13  ;;  %v2815_v13 = vld [vmem:[#allocation5 + $0x500] ss:$16 sps:$4 sm:$0xff]  }
  0x90   :  { %1442 = vmatprep.mubr.bf16.mxu0 %v3230_v36 }
  0x91   :  { %1413 = vmatpush1.bf16.msra.mxu0 %v2731_v14  ;;  %v2820_v14 = vld [vmem:[#allocation5 + $0x12c] ss:$16 sps:$4 sm:$0xff]  }
  0x92   :  { %1414 = vmatprep.subr.bf16.mxu0 %v2739_v17  ;;  %v2823_v17 = vld [vmem:[#allocation5 + $0x2ec] ss:$16 sps:$4 sm:$0xff]  }
  0x95   :  { %2460 = vmatmul.mubr.msk.bf16.vlgmr.msra.gmra.mxu1 %vm1324_vm0, %v3225_v19  ;;  %1415 = vmatpush1.bf16.msra.mxu0 %v2737_v20  ;;  %v3233_v20 = vpack.c.bf16 %v116_v15, %v116_v15  ;;  %v2910_v15 = vld [vmem:[#allocation5 + $0x54c] ss:$16 sps:$4 sm:$0xff]  }
  0x96   :  { %1493 = vmatpush1.bf16.msra.mxu1 %v2734_v18  ;;  %1416 = vmatprep.subr.bf16.mxu0 %v2745_v22  ;;  %v2818_v18 = vld [vmem:[#allocation5 + $0x128] ss:$16 sps:$4 sm:$0xff]   ;;  %v2826_v22 = vld [vmem:[#allocation5 + $0x10c] ss:$16 sps:$4 sm:$0xff]  }
  0x97   :  { %1494 = vmatprep.subr.bf16.mxu1 %v2742_v21  ;;  %1524 = vmatprep.mubr.bf16.mxu1 %v3212_v49  ;;  %v2776_v49 = vld [vmem:[#allocation5 + $0x8] ss:$16 sps:$4 sm:$0xff]  }
  0x98   :  { %v2821_v21 = vld [vmem:[#allocation5 + $0x2e8] ss:$16 sps:$4 sm:$0xff]  }
  0x99   :  { %1417 = vmatpush1.bf16.msra.mxu0 %v2743_v24  ;;  %v2824_v24 = vld [vmem:[#allocation5 + $0x108] ss:$16 sps:$4 sm:$0xff]  }
  0x9a   :  { %1495 = vmatpush1.bf16.msra.mxu1 %v2740_v23  ;;  %1418 = vmatprep.subr.bf16.mxu0 %v2751_v26  ;;  %v2829_v23 = vld [vmem:[#allocation5 + $0x2cc] ss:$16 sps:$4 sm:$0xff]  }
  0x9b   :  { %1496 = vmatprep.subr.bf16.mxu1 %v2748_v25  ;;  %v2827_v25 = vld [vmem:[#allocation5 + $0x2c8] ss:$16 sps:$4 sm:$0xff]   ;;  %v2832_v26 = vld [vmem:[#allocation5 + $0x4ec] ss:$16 sps:$4 sm:$0xff]  }
  0x9d   :  { %1419 = vmatpush1.bf16.msra.mxu0 %v2749_v28  ;;  %v2830_v28 = vld [vmem:[#allocation5 + $0x4e8] ss:$16 sps:$4 sm:$0xff]  }
  0x9e   :  { %1497 = vmatpush1.bf16.msra.mxu1 %v2746_v27  ;;  %1420 = vmatprep.subr.bf16.mxu0 %v2757_v30  ;;  %v2835_v27 = vld [vmem:[#allocation5 + $0x2ac] ss:$16 sps:$4 sm:$0xff]  }
  0x9f   :  { %1498 = vmatprep.subr.bf16.mxu1 %v2754_v29  ;;  %v2833_v29 = vld [vmem:[#allocation5 + $0x2a8] ss:$16 sps:$4 sm:$0xff]   ;;  %v2838_v30 = vld [vmem:[#allocation5 + $0x4cc] ss:$16 sps:$4 sm:$0xff]  }
  0xa1   :  { %1421 = vmatpush1.bf16.msra.mxu0 %v2755_v32  ;;  %v2836_v32 = vld [vmem:[#allocation5 + $0x4c8] ss:$16 sps:$4 sm:$0xff]  }
  0xa2   :  { %1499 = vmatpush1.bf16.msra.mxu1 %v2752_v31  ;;  %1422 = vmatprep.subr.bf16.mxu0 %v2763_v34  ;;  %v2841_v31 = vld [vmem:[#allocation5 + $0x28c] ss:$16 sps:$4 sm:$0xff]  }
  0xa3   :  { %1500 = vmatprep.subr.bf16.mxu1 %v2760_v33  ;;  %v2839_v33 = vld [vmem:[#allocation5 + $0x288] ss:$16 sps:$4 sm:$0xff]   ;;  %v2844_v34 = vld [vmem:[#allocation5 + $0x4ac] ss:$16 sps:$4 sm:$0xff]  }
  0xa5   :  { %1423 = vmatpush1.bf16.msra.mxu0 %v2761_v38  ;;  %v2845_v38 = vld [vmem:[#allocation5 + $0x268] ss:$16 sps:$4 sm:$0xff]  }
  0xa6   :  { %1501 = vmatpush1.bf16.msra.mxu1 %v2758_v37  ;;  %1424 = vmatprep.subr.bf16.mxu0 %v2769_v40  ;;  %v2842_v37 = vld [vmem:[#allocation5 + $0x4a8] ss:$16 sps:$4 sm:$0xff]  }
  0xa7   :  { %1502 = vmatprep.subr.bf16.mxu1 %v2766_v39  ;;  %v2853_v39 = vld [vmem:[#allocation5 + $0x24c] ss:$16 sps:$4 sm:$0xff]   ;;  %v2848_v40 = vld [vmem:[#allocation5 + $0x488] ss:$16 sps:$4 sm:$0xff]  }
  0xa9   :  { %1425 = vmatpush1.bf16.msra.mxu0 %v2767_v42  ;;  %v2856_v42 = vld [vmem:[#allocation5 + $0x46c] ss:$16 sps:$4 sm:$0xff]  }
  0xaa   :  { %1503 = vmatpush1.bf16.msra.mxu1 %v2764_v41  ;;  %1426 = vmatprep.subr.bf16.mxu0 %v2775_v44  ;;  %v2851_v41 = vld [vmem:[#allocation5 + $0x248] ss:$16 sps:$4 sm:$0xff]  }
  0xab   :  { %1504 = vmatprep.subr.bf16.mxu1 %v2772_v43  ;;  %v2854_v43 = vld [vmem:[#allocation5 + $0x468] ss:$16 sps:$4 sm:$0xff]  }
  0xac   :  { %v2857_v44 = vld [vmem:[#allocation5 + $0x228] ss:$16 sps:$4 sm:$0xff]  }
  0xad   :  { %1427 = vmatpush2.bf16.msra.mxu0 %v2773_v46  ;;  %v2865_v46 = vld [vmem:[#allocation5 + $0x20c] ss:$16 sps:$4 sm:$0xff]  }
  0xae   :  { %1505 = vmatpush1.bf16.msra.mxu1 %v2770_v45  ;;  %1428 = vmatprep.subr.bf16.mxu0 %v2781_v48  ;;  %v2862_v45 = vld [vmem:[#allocation5 + $0x44c] ss:$16 sps:$4 sm:$0xff]  }
  0xaf   :  { %1506 = vmatprep.subr.bf16.mxu1 %v2778_v47  ;;  %v2863_v47 = vld [vmem:[#allocation5 + $0x208] ss:$16 sps:$4 sm:$0xff]   ;;  %v2868_v48 = vld [vmem:[#allocation5 + $0x42c] ss:$16 sps:$4 sm:$0xff]  }
  0xb1   :  { %1429 = vmatpush2.bf16.msra.mxu0 %v2779_v50  ;;  %v2866_v50 = vld [vmem:[#allocation5 + $0x428] ss:$16 sps:$4 sm:$0xff]  }
  0xb2   :  { %1507 = vmatpush1.bf16.msra.mxu1 %v2776_v49  ;;  %1430 = vmatprep.subr.bf16.mxu0 %v2787_v53  ;;  %v2871_v49 = vld [vmem:[#allocation5 + $0x3ec] ss:$16 sps:$4 sm:$0xff]  }
  0xb3   :  { %1508 = vmatprep.subr.bf16.mxu1 %v2784_v51  ;;  %v2869_v51 = vld [vmem:[#allocation5 + $0x3e8] ss:$16 sps:$4 sm:$0xff]   ;;  %v2874_v53 = vld [vmem:[#allocation5 + $0x40c] ss:$16 sps:$4 sm:$0xff]  }
  0xb5   :  { %1431 = vmatpush2.bf16.msra.mxu0 %v2785_v55  ;;  %v2872_v55 = vld [vmem:[#allocation5 + $0x408] ss:$16 sps:$4 sm:$0xff]  }
  0xb6   :  { %1509 = vmatpush2.bf16.msra.mxu1 %v2782_v54  ;;  %1432 = vmatprep.subr.bf16.mxu0 %v2793_v57  ;;  %v2877_v54 = vld [vmem:[#allocation5 + $0x3cc] ss:$16 sps:$4 sm:$0xff]  }
  0xb7   :  { %1510 = vmatprep.subr.bf16.mxu1 %v2790_v56  ;;  %v2875_v56 = vld [vmem:[#allocation5 + $0x3c8] ss:$16 sps:$4 sm:$0xff]   ;;  %v2880_v57 = vld [vmem:[#allocation5 + $0x5ec] ss:$16 sps:$4 sm:$0xff]  }
  0xb9   :  { %1433 = vmatpush2.bf16.msra.mxu0 %v2791_v59  ;;  %v2878_v59 = vld [vmem:[#allocation5 + $0x5e8] ss:$16 sps:$4 sm:$0xff]  }
  0xba   :  { %1511 = vmatpush2.bf16.msra.mxu1 %v2788_v58  ;;  %1434 = vmatprep.subr.bf16.mxu0 %v2799_v61  ;;  %v2883_v58 = vld [vmem:[#allocation5 + $0x3ac] ss:$16 sps:$4 sm:$0xff]  }
  0xbb   :  { %1512 = vmatprep.subr.bf16.mxu1 %v2796_v60  ;;  %v2881_v60 = vld [vmem:[#allocation5 + $0x3a8] ss:$16 sps:$4 sm:$0xff]   ;;  %v2886_v61 = vld [vmem:[#allocation5 + $0x5cc] ss:$16 sps:$4 sm:$0xff]  }
  0xbd   :  { %1435 = vmatpush2.bf16.msra.mxu0 %v2797_v63  ;;  %v2884_v63 = vld [vmem:[#allocation5 + $0x5c8] ss:$16 sps:$4 sm:$0xff]  }
  0xbe   :  { %1513 = vmatpush2.bf16.msra.mxu1 %v2794_v62  ;;  %1436 = vmatprep.subr.bf16.mxu0 %v2805_v1  ;;  %v2889_v62 = vld [vmem:[#allocation5 + $0x38c] ss:$16 sps:$4 sm:$0xff]  }
  0xbf   :  { %1514 = vmatprep.subr.bf16.mxu1 %v2802_v0  ;;  %v2887_v0 = vld [vmem:[#allocation5 + $0x388] ss:$16 sps:$4 sm:$0xff]   ;;  %v2892_v1 = vld [vmem:[#allocation5 + $0x5ac] ss:$16 sps:$4 sm:$0xff]  }
  0xc1   :  { %1437 = vmatpush2.bf16.msra.mxu0 %v2803_v3  ;;  %v2890_v3 = vld [vmem:[#allocation5 + $0x5a8] ss:$16 sps:$4 sm:$0xff]  }
  0xc2   :  { %1515 = vmatpush2.bf16.msra.mxu1 %v2800_v2  ;;  %1438 = vmatprep.subr.bf16.mxu0 %v2811_v5  ;;  %v2895_v2 = vld [vmem:[#allocation5 + $0x36c] ss:$16 sps:$4 sm:$0xff]  }
  0xc3   :  { %1516 = vmatprep.subr.bf16.mxu1 %v2808_v4  ;;  %v2893_v4 = vld [vmem:[#allocation5 + $0x368] ss:$16 sps:$4 sm:$0xff]   ;;  %v2898_v5 = vld [vmem:[#allocation5 + $0x58c] ss:$16 sps:$4 sm:$0xff]  }
  0xc5   :  { %1439 = vmatpush2.bf16.msra.mxu0 %v2809_v7  ;;  %v2896_v7 = vld [vmem:[#allocation5 + $0x588] ss:$16 sps:$4 sm:$0xff]  }
  0xc6   :  { %1517 = vmatpush2.bf16.msra.mxu1 %v2806_v6  ;;  %1440 = vmatprep.subr.bf16.mxu0 %v2817_v11  ;;  %v2901_v6 = vld [vmem:[#allocation5 + $0x34c] ss:$16 sps:$4 sm:$0xff]  }
  0xc7   :  { %1518 = vmatprep.subr.bf16.mxu1 %v2814_v10  ;;  %v2899_v10 = vld [vmem:[#allocation5 + $0x348] ss:$16 sps:$4 sm:$0xff]   ;;  %v2904_v11 = vld [vmem:[#allocation5 + $0x56c] ss:$16 sps:$4 sm:$0xff]  }
  0xc9   :  { %1441 = vmatpush2.bf16.msra.mxu0 %v2815_v13  ;;  %v2902_v13 = vld [vmem:[#allocation5 + $0x568] ss:$16 sps:$4 sm:$0xff]  }
  0xca   :  { %1519 = vmatpush2.bf16.msra.mxu1 %v2812_v12  ;;  %1533 = vmatprep.subr.bf16.mxu0 %v2823_v17  ;;  %v2907_v12 = vld [vmem:[#allocation5 + $0x32c] ss:$16 sps:$4 sm:$0xff]  }
  0xcb   :  { %1520 = vmatprep.subr.bf16.mxu1 %v2820_v14  ;;  %v2905_v14 = vld [vmem:[#allocation5 + $0x328] ss:$16 sps:$4 sm:$0xff]   ;;  %v2913_v17 = vld [vmem:[#allocation5 + $0x30c] ss:$16 sps:$4 sm:$0xff]  }
  0xcc   :  { %1443 = vmatmul.mubr.bf16.vlgmr.msra.gmra.mxu0 %v3233_v20 }
  0xcd   :  { %1534 = vmatpush1.bf16.msra.mxu0 %v2821_v21  ;;  %1565 = vmatprep.mubr.bf16.mxu0 %v3214_v52  ;;  %v2850_v52 = vld [vmem:[#allocation5 + $0x48c] ss:$16 sps:$4 sm:$0xff]   ;;  %v2911_v21 = vld [vmem:[#allocation5 + $0x308] ss:$16 sps:$4 sm:$0xff]  }
  0xce   :  { %1521 = vmatpush2.bf16.msra.mxu1 %v2818_v18  ;;  %1535 = vmatprep.subr.bf16.mxu0 %v2829_v23  ;;  %v2908_v18 = vld [vmem:[#allocation5 + $0x548] ss:$16 sps:$4 sm:$0xff]   ;;  %v2919_v23 = vld [vmem:[#allocation5 + $0x60c] ss:$16 sps:$4 sm:$0xff]  }
  0xcf   :  { %1522 = vmatprep.subr.bf16.mxu1 %v2826_v22  ;;  %v2916_v22 = vld [vmem:[#allocation5 + $0x52c] ss:$16 sps:$4 sm:$0xff]  }
  0xd1   :  { %1536 = vmatpush1.bf16.msra.mxu0 %v2827_v25  ;;  %v2917_v25 = vld [vmem:[#allocation5 + $0x608] ss:$16 sps:$4 sm:$0xff]  }
  0xd2   :  { %1523 = vmatpush2.bf16.msra.mxu1 %v2824_v24  ;;  %1537 = vmatprep.subr.bf16.mxu0 %v2835_v27  ;;  %v2914_v24 = vld [vmem:[#allocation5 + $0x528] ss:$16 sps:$4 sm:$0xff]   ;;  %v2923_v27 = vld [vmem:[#allocation8 + $0x78] sm:$0xff]  }
  0xd3   :  { %1574 = vmatprep.subr.bf16.mxu1 %v2832_v26  ;;  %v2922_v26 = vld [vmem:[#allocation5 + $0x50c] ss:$16 sps:$4 sm:$0xff]  }
  0xd5   :  { %1525 = vmatmul.mubr.bf16.vlgmr.msra.gmra.mxu1 %v3218_v8  ;;  %1538 = vmatpush1.bf16.msra.mxu0 %v2833_v29  ;;  %v2859_v8 = vld [vmem:[#allocation5 + $0x22c] ss:$16 sps:$4 sm:$0xff]  }
  0xd6   :  { %1575 = vmatpush1.bf16.msra.mxu1 %v2830_v28  ;;  %1539 = vmatprep.subr.bf16.mxu0 %v2841_v31  ;;  %v2920_v28 = vld [vmem:[#allocation5 + $0x508] ss:$16 sps:$4 sm:$0xff]   ;;  %v2924_v29 = vld [vmem:[#allocation8 + $0x38] sm:$0xff]  }
  0xd7   :  { %1576 = vmatprep.subr.bf16.mxu1 %v2838_v30  ;;  %1606 = vmatprep.mubr.bf16.mxu1 %v3230_v36  ;;  %v2860_v36 = vld [vmem:[#allocation5 + $0x448] ss:$16 sps:$4 sm:$0xff]  }
  0xd8   :  { %v2925_v30 = vld [vmem:[#allocation8 + $0x70] sm:$0xff]  }
  0xd9   :  { %1540 = vmatpush1.bf16.msra.mxu0 %v2839_v33  ;;  %v2926_v31 = vld [vmem:[#allocation8 + $0x30] sm:$0xff]   ;;  %v2929_v33 = vld [vmem:[#allocation8 + $0x60] sm:$0xff]  }
  0xda   :  { %1577 = vmatpush1.bf16.msra.mxu1 %v2836_v32  ;;  %1541 = vmatprep.subr.bf16.mxu0 %v2847_v35  ;;  %v2927_v32 = vld [vmem:[#allocation8 + $0x68] sm:$0xff]   ;;  %v2940_v35 = vld [vmem:[#allocation8 + $0xb8] sm:$0xff]  }
  0xdb   :  { %1578 = vmatprep.subr.bf16.mxu1 %v2844_v34  ;;  %v2939_v34 = vld [vmem:[#allocation8 + $0xf8] sm:$0xff]  }
  0xdd   :  { %1542 = vmatpush1.bf16.msra.mxu0 %v2845_v38  ;;  %v2942_v38 = vld [vmem:[#allocation8 + $0xb0] sm:$0xff]  }
  0xde   :  { %1579 = vmatpush1.bf16.msra.mxu1 %v2842_v37  ;;  %1543 = vmatprep.subr.bf16.mxu0 %v2853_v39  ;;  %v2930_v37 = vld [vmem:[#allocation8 + $0x20] sm:$0xff]   ;;  %v2944_v39 = vld [vmem:[#allocation8 + $0xa8] sm:$0xff]  }
  0xdf   :  { %1580 = vmatprep.subr.bf16.mxu1 %v2850_v52  ;;  %v2932_v52 = vld [vmem:[#allocation8 + $0x18] sm:$0xff]  }
  0xe1   :  { %1544 = vmatpush1.bf16.msra.mxu0 %v2851_v41  ;;  %v2934_v41 = vld [vmem:[#allocation8 + $0x10] sm:$0xff]  }
  0xe2   :  { %1581 = vmatpush1.bf16.msra.mxu1 %v2848_v40  ;;  %1545 = vmatprep.subr.bf16.mxu0 %v2859_v8  ;;  %v2933_v40 = vld [vmem:[#allocation8 + $0x50] sm:$0xff]   ;;  %v2936_v8 = vld [vmem:[#allocation8 + $0x8] sm:$0xff]  }
  0xe3   :  { %1582 = vmatprep.subr.bf16.mxu1 %v2856_v42  ;;  %v2935_v42 = vld [vmem:[#allocation8 + $0x48] sm:$0xff]  }
  0xe5   :  { %1546 = vmatpush1.bf16.msra.mxu0 %v2857_v44  ;;  %v2938_v44 = vld [vmem:[#allocation8] sm:$0xff]  }
  0xe6   :  { %1583 = vmatpush1.bf16.msra.mxu1 %v2854_v43  ;;  %1547 = vmatprep.subr.bf16.mxu0 %v2865_v46  ;;  %v2937_v43 = vld [vmem:[#allocation8 + $0x40] sm:$0xff]  }
  0xe7   :  { %1584 = vmatprep.subr.bf16.mxu1 %v2862_v45  ;;  %v2945_v45 = vld [vmem:[#allocation8 + $0xe0] sm:$0xff]  }
  0xe9   :  { %1548 = vmatpush1.bf16.msra.mxu0 %v2863_v47  ;;  %v2946_v47 = vld [vmem:[#allocation8 + $0xa0] sm:$0xff]  }
  0xea   :  { %1585 = vmatpush1.bf16.msra.mxu1 %v2860_v36  ;;  %1549 = vmatprep.subr.bf16.mxu0 %v2871_v49 }
  0xeb   :  { %1586 = vmatprep.subr.bf16.mxu1 %v2868_v48 }
  0xed   :  { %1550 = vmatpush2.bf16.msra.mxu0 %v2869_v51 }
  0xee   :  { %1587 = vmatpush1.bf16.msra.mxu1 %v2866_v50  ;;  %1551 = vmatprep.subr.bf16.mxu0 %v2877_v54  ;;  %v2947_v50 = vld [vmem:[#allocation8 + $0xd8] sm:$0xff]  }
  0xef   :  { %1588 = vmatprep.subr.bf16.mxu1 %v2874_v53  ;;  %v2948_v54 = vld [vmem:[#allocation8 + $0x98] sm:$0xff]  }
  0xf1   :  { %1552 = vmatpush2.bf16.msra.mxu0 %v2875_v56 }
  0xf2   :  { %1589 = vmatpush1.bf16.msra.mxu1 %v2872_v55  ;;  %1553 = vmatprep.subr.bf16.mxu0 %v2883_v58 }
  0xf3   :  { %1590 = vmatprep.subr.bf16.mxu1 %v2880_v57  ;;  %v2949_v57 = vld [vmem:[#allocation8 + $0xd0] sm:$0xff]  }
  0xf5   :  { %1554 = vmatpush2.bf16.msra.mxu0 %v2881_v60 }
  0xf6   :  { %1591 = vmatpush2.bf16.msra.mxu1 %v2878_v59  ;;  %1555 = vmatprep.subr.bf16.mxu0 %v2889_v62  ;;  %v2950_v59 = vld [vmem:[#allocation8 + $0x90] sm:$0xff]  }
  0xf7   :  { %1592 = vmatprep.subr.bf16.mxu1 %v2886_v61  ;;  %v2951_v61 = vld [vmem:[#allocation8 + $0xc8] sm:$0xff]  }
  0xf9   :  { %1556 = vmatpush2.bf16.msra.mxu0 %v2887_v0 }
  0xfa   :  { %1593 = vmatpush2.bf16.msra.mxu1 %v2884_v63  ;;  %1557 = vmatprep.subr.bf16.mxu0 %v2895_v2  ;;  %v2952_v63 = vld [vmem:[#allocation8 + $0x88] sm:$0xff]   ;;  %v2954_v2 = vld [vmem:[#allocation8 + $0x80] sm:$0xff]  }
  0xfb   :  { %1594 = vmatprep.subr.bf16.mxu1 %v2892_v1  ;;  %v2953_v1 = vld [vmem:[#allocation8 + $0xc0] sm:$0xff]  }
  0xfd   :  { %1558 = vmatpush2.bf16.msra.mxu0 %v2893_v4 }
  0xfe   :  { %1595 = vmatpush2.bf16.msra.mxu1 %v2890_v3  ;;  %1559 = vmatprep.subr.bf16.mxu0 %v2901_v6  ;;  %v324_v3 = vlaneseq  ;;  %v322_v6 = vld [vmem:[#allocation7] sm:$0xf] }
  0xff   :  { %1596 = vmatprep.subr.bf16.mxu1 %v2898_v5 }
 0x100   :  { %v325_v4 = vshrl.u32 %v324_v3, 7  ;;  %v2959_v3 = vld [vmem:[#allocation10 + $0x18] sm:$0xff]  }
 0x101   :  { %1560 = vmatpush2.bf16.msra.mxu0 %v2899_v10 }
 0x102   :  { %1597 = vmatpush2.bf16.msra.mxu1 %v2896_v7  ;;  %1561 = vmatprep.subr.bf16.mxu0 %v2907_v12  ;;  %v326_v5 = vsub.s32 0, %v325_v4  ;;  %v330_v7 = vsub.s32 1, %v325_v4 }
 0x103   :  { %1598 = vmatprep.subr.bf16.mxu1 %v2904_v11 }
 0x104   :  { %v327_v10 = vrot.slane %v322_v6, %v326_v5  ;;  %v331_v11 = vrot.slane %v322_v6, %v330_v7  ;;  %v2961_v5 = vld [vmem:[#allocation10 + $0x8] sm:$0xff]   ;;  %v2963_v7 = vld [vmem:[#allocation11 + $0x38] sm:$0xff]  }
 0x105   :  { %1562 = vmatpush2.bf16.msra.mxu0 %v2905_v14 }
 0x106   :  { %1599 = vmatpush2.bf16.msra.mxu1 %v2902_v13  ;;  %1563 = vmatprep.subr.bf16.mxu0 %v2913_v17 }
 0x107   :  { %1600 = vmatprep.subr.bf16.mxu1 %v2910_v15 }
 0x109   :  { %1564 = vmatpush2.bf16.msra.mxu0 %v2911_v21 }
 0x10a   :  { %1601 = vmatpush2.bf16.msra.mxu1 %v2908_v18  ;;  %1629 = vmatprep.subr.bf16.mxu0 %v2919_v23 }
 0x10b   :  { %1602 = vmatprep.subr.bf16.mxu1 %v2916_v22 }
 0x10c   :  { %1566 = vmatmul.mubr.bf16.vlgmr.msra.gmra.mxu0 %v3220_v9  ;;  %v2928_v9 = vld [vmem:[#allocation8 + $0x28] sm:$0xff]  }
 0x10d   :  { %1630 = vmatpush1.bf16.msra.mxu0 %v2917_v25  ;;  %1647 = vmatprep.mubr.bf16.mxu0 %v3131_v16  ;;  %v2941_v16 = vld [vmem:[#allocation8 + $0xf0] sm:$0xff]  }
 0x10e   :  { %1603 = vmatpush2.bf16.msra.mxu1 %v2914_v24  ;;  %2513 = vmatprep.subr.bf16.mxu0 %v2923_v27 }
 0x10f   :  { %1604 = vmatprep.subr.bf16.mxu1 %v2922_v26 }
 0x112   :  { %1605 = vmatpush2.bf16.msra.mxu1 %v2920_v28 }
 0x113   :  { %2535 = vmatprep.subr.bf16.mxu1 %v2939_v34 }
 0x114   :  { %2461 = vmatmul.mubr.msk.bf16.vlgmr.msra.gmra.mxu0 %vm1324_vm0, %v3225_v19  ;;  %v2943_v19 = vld [vmem:[#allocation8 + $0xe8] sm:$0xff]  }
 0x115   :  { %1607 = vmatmul.mubr.bf16.vlgmr.msra.gmra.mxu1 %v3233_v20  ;;  %2514 = vmatpush3.bf16.msra.mxu0 %v2924_v29  ;;  %v2931_v20 = vld [vmem:[#allocation8 + $0x58] sm:$0xff]  }
 0x116   :  { %2515 = vmatprep.subr.bf16.mxu0 %v2925_v30  ;;  %2536 = vmatpush3.bf16.msra.mxu1 %v2940_v35 }
 0x117   :  { %2537 = vmatprep.subr.bf16.mxu1 %v2941_v16  ;;  %v334_v16 = vsub.s32 2, %v325_v4 }
 0x119   :  { %2516 = vmatpush3.bf16.msra.mxu0 %v2926_v31 }
 0x11a   :  { %2517 = vmatprep.subr.bf16.mxu0 %v2927_v32  ;;  %2538 = vmatpush3.bf16.msra.mxu1 %v2942_v38 }
 0x11b   :  { %2539 = vmatprep.subr.bf16.mxu1 %v2943_v19 }
 0x11d   :  { %2518 = vmatpush3.bf16.msra.mxu0 %v2928_v9 }
 0x11e   :  { %2519 = vmatprep.subr.bf16.mxu0 %v2929_v33  ;;  %2540 = vmatpush3.bf16.msra.mxu1 %v2944_v39 }
 0x11f   :  { %2541 = vmatprep.subr.bf16.mxu1 %v2945_v45 }
 0x121   :  { %2520 = vmatpush3.bf16.msra.mxu0 %v2930_v37  ;;  %v338_v37 = vsub.s32 3, %v325_v4  ;;  %v2960_v4 = vld [vmem:[#allocation10 + $0x10] sm:$0xff]  }
 0x122   :  { %2521 = vmatprep.subr.bf16.mxu0 %v2931_v20  ;;  %2542 = vmatpush3.bf16.msra.mxu1 %v2946_v47  ;;  %v335_v20 = vrot.slane %v322_v6, %v334_v16 }
 0x123   :  { %2543 = vmatprep.subr.bf16.mxu1 %v2947_v50 }
 0x125   :  { %2522 = vmatpush3.bf16.msra.mxu0 %v2932_v52  ;;  %v339_v52 = vrot.slane %v322_v6, %v338_v37  ;;  %v2962_v6 = vld [vmem:[#allocation10] sm:$0xff]  }
 0x126   :  { %2523 = vmatprep.subr.bf16.mxu0 %v2933_v40  ;;  %2544 = vmatpush3.bf16.msra.mxu1 %v2948_v54 }
 0x127   :  { %2545 = vmatprep.subr.bf16.mxu1 %v2949_v57 }
 0x129   :  { %2524 = vmatpush3.bf16.msra.mxu0 %v2934_v41 }
 0x12a   :  { %2525 = vmatprep.subr.bf16.mxu0 %v2935_v42  ;;  %2546 = vmatpush3.bf16.msra.mxu1 %v2950_v59 }
 0x12b   :  { %2547 = vmatprep.subr.bf16.mxu1 %v2951_v61 }
 0x12d   :  { %2526 = vmatpush3.bf16.msra.mxu0 %v2936_v8 }
 0x12e   :  { %2527 = vmatprep.subr.bf16.mxu0 %v2937_v43  ;;  %2548 = vmatpush3.bf16.msra.mxu1 %v2952_v63  ;;  %v3132_v63 = vmov 0.0  }
 0x12f   :  { %2549 = vmatprep.subr.bf16.mxu1 %v2953_v1  ;;  %v2957_v1 = vld [vmem:[#allocation10 + $0x28] sm:$0xff]  }
 0x131   :  { %2528 = vmatpush3.bf16.msra.mxu0 %v2938_v44 }
 0x132   :  { %2550 = vmatpush3.bf16.msra.mxu1 %v2954_v2  ;;  %2575 = vmatprep.subr.bf16.mxu0 %v3132_v63  ;;  %v2958_v2 = vld [vmem:[#allocation10 + $0x20] sm:$0xff]  }
 0x133   :  { %2595 = vmatprep.subr.bf16.mxu1 %v3132_v63 }
 0x14c   :  { %v1362_v46 = vpop.f32.mrf.mxu0 }
 0x14d   :  { %v1403_v36 = vpop.f32.mrf.mxu1  ;;  %v1363_v12 = vadd.f32 %v1362_v46, %v327_v10  ;;  %v2964_v10 = vld [vmem:[#allocation11 + $0x30] sm:$0xff]  }
 0x14e   :  { %v1364_v48 = vpop.f32.mrf.mxu0 }
 0x14f   :  { %v1405_v49 = vpop.f32.mrf.mxu1  ;;  %v1365_v13 = vadd.f32 %v1364_v48, %v331_v11  ;;  %v1404_v14 = vadd.f32 %v1403_v36, %v1363_v12  ;;  %v2965_v11 = vld [vmem:[#allocation11 + $0x28] sm:$0xff]   ;;  %v2966_v12 = vld [vmem:[#allocation11 + $0x20] sm:$0xff]  }
 0x150   :  { %v1366_v51 = vpop.f32.mrf.mxu0 }
 0x151   :  { %v1407_v53 = vpop.f32.mrf.mxu1  ;;  %v1406_v17 = vadd.f32 %v1405_v49, %v1365_v13  ;;  %v2967_v13 = vld [vmem:[#allocation11 + $0x18] sm:$0xff]  }
 0x152   :  { %v1367_v55 = vpop.f32.mrf.mxu0 }
 0x153   :  { %v1408_v56 = vpop.f32.mrf.mxu1 }
 0x155   :  { %v1485_v58 = vpop.f32.mrf.mxu1 }
 0x157   :  { %v1487_v60 = vpop.f32.mrf.mxu1 }
 0x159   :  { %v1489_v62 = vpop.f32.mrf.mxu1 }
 0x15a   :  { %v2955_v62 = vld [vmem:[#allocation10 + $0x38] sm:$0xff]  }
 0x15b   :  { %v1490_v0 = vpop.f32.mrf.mxu1 }
 0x15c   :  { %v2956_v0 = vld [vmem:[#allocation10 + $0x30] sm:$0xff]  }
 0x18c   :  { %v1444_v15 = vpop.f32.mrf.mxu0 }
 0x18d   :  { %v1445_v18 = vadd.f32 %v1444_v15, %v1404_v14  ;;  %v2968_v14 = vld [vmem:[#allocation11 + $0x10] sm:$0xff]  }
 0x18e   :  { %v1446_v21 = vpop.f32.mrf.mxu0 }
 0x18f   :  { %v1486_v22 = vadd.f32 %v1485_v58, %v1445_v18  ;;  %v1447_v23 = vadd.f32 %v1446_v21, %v1406_v17 }
 0x190   :  { %v1448_v24 = vpop.f32.mrf.mxu0 }
 0x191   :  { %vm1656_vm1 = vcmp.ge.f32.partialorder %v1486_v22, 0.0  ;;  %v1660_v25 = vmul.f32 0.01, %v1486_v22  ;;  %v1488_v26 = vadd.f32 %v1487_v60, %v1447_v23  ;;  %v2462_v23 = vld [vmem:[%s3278_s4] ss:$0 sm:$0xff] }
 0x192   :  { %v1449_v27 = vpop.f32.mrf.mxu0 }
 0x193   :  { %v1661_v28 = vmul.f32 0.01, %v1488_v26  ;;  %vm1657_vm2 = vcmp.ge.f32.partialorder %v1488_v26, 0.0  ;;  %v1664_v29 = vsel %vm1656_vm1, %v1486_v22, %v1660_v25 }
 0x194   :  { %v1668_v33 = vpack.c.bf16 %v1664_v29, %v1664_v29 }
 0x195   :  { %v1526_v30 = vpop.f32.mrf.mxu1  ;;  %v1665_v31 = vsel %vm1657_vm2, %v1488_v26, %v1661_v28 }
 0x196   :  { %v1669_v9 = vpack.c.bf16 %v1665_v31, %v1665_v31  ;;  %v1527_v40 = vadd.f32 %v1526_v30, %v335_v20 }
 0x197   :  { %v1528_v32 = vpop.f32.mrf.mxu1 }
 0x198   :  { %1967 = vmatprep.mubr.bf16.mxu0 %v1669_v9  ;;  %v1529_v42 = vadd.f32 %v1528_v32, %v339_v52 }
 0x199   :  { %v1530_v34 = vpop.f32.mrf.mxu1  ;;  %1968 = vmatmul.mubr.bf16.vlgmr.msra.gmra.mxu0 %v1668_v33  ;;  %v2969_v33 = vld [vmem:[#allocation11 + $0x8] sm:$0xff]  }
 0x19a   :  { %2576 = vmatpush3.bf16.msra.mxu0 %v2955_v62  ;;  %2591 = vmatprep.mubr.msk.bf16.mxu0 %vm3133_vm5, %v3132_v63  ;;  %v2970_v34 = vld [vmem:[#allocation11] sm:$0xff]  }
 0x19b   :  { %v1531_v35 = vpop.f32.mrf.mxu1  ;;  %2577 = vmatprep.subr.bf16.mxu0 %v3132_v63 }
 0x19c   :  { %v2495_v35 = vld [vmem:[%s3280_s6] ss:$0 sm:$0xff]  ;;  %s3091_s6 = scalar_lea.vmem %s2253_s22, 128 }
 0x19d   :  { %p3092_p2 = scmp.ne.s32.totalorder %s2253_s22, %s3091_s6  ;;  %p3097_p4 = scmp.lt.s32.totalorder %s3091_s6, %s3091_s6 }
 0x19e   :  { %2578 = vmatpush3.bf16.msra.mxu0 %v2956_v0 }
 0x19f   :  { %2579 = vmatprep.subr.bf16.mxu0 %v3132_v63  ;;  %p3098_p5 = por %p3097_p4, %p3096_p3 }
 0x1a1   :  { %p3099_p6 = pnand %p3098_p5, %p3092_p2 }
 0x1a2   :  { %2580 = vmatpush3.bf16.msra.mxu0 %v2957_v1 }
 0x1a3   :  { %2581 = vmatprep.subr.bf16.mxu0 %v3132_v63 }
 0x1a6   :  { %2582 = vmatpush3.bf16.msra.mxu0 %v2958_v2 }
 0x1a7   :  { %2583 = vmatprep.subr.bf16.mxu0 %v3132_v63 }
 0x1aa   :  { %2584 = vmatpush3.bf16.msra.mxu0 %v2959_v3 }
 0x1ab   :  { %2585 = vmatprep.subr.bf16.mxu0 %v3132_v63 }
 0x1ae   :  { %2586 = vmatpush3.bf16.msra.mxu0 %v2960_v4 }
 0x1af   :  { %2587 = vmatprep.subr.bf16.mxu0 %v3132_v63 }
 0x1b2   :  { %2588 = vmatpush3.bf16.msra.mxu0 %v2961_v5 }
 0x1b3   :  { %2589 = vmatprep.subr.bf16.mxu0 %v3132_v63 }
 0x1b6   :  { %2590 = vmatpush3.bf16.msra.mxu0 %v2962_v6 }
 0x1cc   :  { %v1567_v38 = vpop.f32.mrf.mxu0 }
 0x1cd   :  { %v1568_v8 = vadd.f32 %v1567_v38, %v1527_v40 }
 0x1ce   :  { %v1569_v19 = vpop.f32.mrf.mxu0 }
 0x1cf   :  { %v1570_v45 = vadd.f32 %v1569_v19, %v1529_v42 }
 0x1d0   :  { %v1571_v39 = vpop.f32.mrf.mxu0 }
 0x1d2   :  { %v1572_v41 = vpop.f32.mrf.mxu0 }
 0x1d3   :  { %v2504_v41 = vld [vmem:[%s3282_s8] ss:$0 sm:$0xff] }
 0x1d4   :  { %v1649_v44 = vpop.f32.mrf.mxu0 }
 0x1d5   :  { %v1608_v43 = vpop.f32.mrf.mxu1 }
 0x1d6   :  { %v1609_v46 = vadd.f32 %v1608_v43, %v1568_v8  ;;  %v1651_v47 = vpop.f32.mrf.mxu0 }
 0x1d7   :  { %v1610_v36 = vpop.f32.mrf.mxu1 }
 0x1d8   :  { %v1650_v48 = vadd.f32 %v1649_v44, %v1609_v46  ;;  %v1611_v49 = vadd.f32 %v1610_v36, %v1570_v45  ;;  %v1653_v51 = vpop.f32.mrf.mxu0 }
 0x1d9   :  { %v1612_v50 = vpop.f32.mrf.mxu1 }
 0x1da   :  { %vm1658_vm3 = vcmp.ge.f32.partialorder %v1650_v48, 0.0  ;;  %v1662_v53 = vmul.f32 0.01, %v1650_v48  ;;  %v1652_v54 = vadd.f32 %v1651_v47, %v1611_v49  ;;  %v1654_v56 = vpop.f32.mrf.mxu0 }
 0x1db   :  { %v1613_v55 = vpop.f32.mrf.mxu1 }
 0x1dc   :  { %vm1659_vm4 = vcmp.ge.f32.partialorder %v1652_v54, 0.0  ;;  %v1663_v57 = vmul.f32 0.01, %v1652_v54  ;;  %v1666_v58 = vsel %vm1658_vm3, %v1650_v48, %v1662_v53 }
 0x1dd   :  { %v1670_v61 = vpack.c.bf16 %v1666_v58, %v1666_v58 }
 0x1de   :  { %v1667_v59 = vsel %vm1659_vm4, %v1652_v54, %v1663_v57 }
 0x1df   :  { %v1671_v60 = vpack.c.bf16 %v1667_v59, %v1667_v59 }
 0x1e1   :  { %2007 = vmatprep.mubr.bf16.mxu1 %v1671_v60 }
 0x1e2   :  { %2008 = vmatmul.mubr.bf16.vlgmr.msra.gmra.mxu1 %v1670_v61 }
 0x1e3   :  { %2611 = vmatprep.mubr.msk.bf16.mxu1 %vm3133_vm5, %v3132_v63  ;;  %2596 = vmatpush3.bf16.msra.mxu1 %v2963_v7 }
 0x1e4   :  { %2597 = vmatprep.subr.bf16.mxu1 %v3132_v63 }
 0x1e7   :  { %2598 = vmatpush3.bf16.msra.mxu1 %v2964_v10 }
 0x1e8   :  { %2599 = vmatprep.subr.bf16.mxu1 %v3132_v63 }
 0x1eb   :  { %2600 = vmatpush3.bf16.msra.mxu1 %v2965_v11 }
 0x1ec   :  { %2601 = vmatprep.subr.bf16.mxu1 %v3132_v63 }
 0x1ef   :  { %2602 = vmatpush3.bf16.msra.mxu1 %v2966_v12 }
 0x1f0   :  { %2603 = vmatprep.subr.bf16.mxu1 %v3132_v63 }
 0x1f3   :  { %2604 = vmatpush3.bf16.msra.mxu1 %v2967_v13 }
 0x1f4   :  { %2605 = vmatprep.subr.bf16.mxu1 %v3132_v63 }
 0x1f7   :  { %2606 = vmatpush3.bf16.msra.mxu1 %v2968_v14 }
 0x1f8   :  { %2607 = vmatprep.subr.bf16.mxu1 %v3132_v63 }
 0x1fb   :  { %2608 = vmatpush3.bf16.msra.mxu1 %v2969_v33 }
 0x1fc   :  { %2609 = vmatprep.subr.bf16.mxu1 %v3132_v63 }
 0x1ff   :  { %2610 = vmatpush3.bf16.msra.mxu1 %v2970_v34 }
 0x259   :  { %v2529_v15 = vpop.f32.mrf.mxu0 }
 0x25b   :  { %v2530_v17 = vpop.f32.mrf.mxu0 }
 0x25c   :  { %v2531_v18 = vadd.f32 %v2530_v17, %v2529_v15 }
 0x25d   :  { %v2532_v21 = vpop.f32.mrf.mxu0 }
 0x25e   :  { %v1970_v26 = vadd.f32 %v2531_v18, %v2462_v23 }
 0x25f   :  { %v2533_v22 = vpop.f32.mrf.mxu0 }
 0x2a2   :  { %v2551_v24 = vpop.f32.mrf.mxu1 }
 0x2a4   :  { %v2552_v25 = vpop.f32.mrf.mxu1 }
 0x2a5   :  { %v2553_v27 = vadd.f32 %v2552_v25, %v2551_v24 }
 0x2a6   :  { %v2554_v28 = vpop.f32.mrf.mxu1 }
 0x2a7   :  { %v2010_v29 = vadd.f32 %v2553_v27, %v1970_v26 }
 0x2a8   :  { %v2555_v30 = vpop.f32.mrf.mxu1 }
 0x2a9   :  { %vm2015_vm6 = vcmp.ge.f32.partialorder %v2010_v29, 0.0  ;;  %v2016_v31 = vmul.f32 0.01, %v2010_v29 }
 0x2ab   :  { %v2017_v32 = vsel %vm2015_vm6, %v2010_v29, %v2016_v31 }
 0x2ac   :  { %v2018_v9 = vpack.c.bf16 %v2017_v32, %v2017_v32 }
 0x2ae   :  { %2592 = vmatmul.mubr.bf16.vlgmr.msra.gmra.mxu0 %v2018_v9 }
 0x36e   :  { %v2124_v16 = vpop.f32.mrf.mxu0 }
 0x36f   :  { %v2125_v37 = vadd.f32 %v2495_v35, %v2124_v16 }
 0x370   :  { %v2593_v38 = vpop.f32.mrf.mxu0 }
 0x371   :  { %vm2130_vm7 = vcmp.ge.f32.partialorder %v2125_v37, 0.0  ;;  %v2131_v20 = vmul.f32 0.01, %v2125_v37 }
 0x372   :  { %v2127_v19 = vpop.f32.mrf.mxu0 }
 0x373   :  { %v2132_v52 = vsel %vm2130_vm7, %v2125_v37, %v2131_v20 }
 0x374   :  { %v2133_v39 = vpack.c.bf16 %v2132_v52, %v2132_v52  ;;  %v2594_v40 = vpop.f32.mrf.mxu0 }
 0x376   :  { %2612 = vmatmul.mubr.bf16.vlgmr.msra.gmra.mxu1 %v2133_v39 }
 0x436   :  { %v2239_v42 = vpop.f32.mrf.mxu1 }
 0x437   :  { %v2240_v8 = vadd.f32 %v2504_v41, %v2239_v42 }
 0x438   :  { %v2613_v43 = vpop.f32.mrf.mxu1 }
 0x439   :  { %2245 = vst [vmem:[#allocation13] sm:$0xff] %v2240_v8 }
 0x43a   :  { %v2242_v44 = vpop.f32.mrf.mxu1 }
 0x43b   :  { %3102 = shalt.err (!%p3099_p6)
}
 0x43c   :  { %2255 = dma.vmem_to_hbm [thread:$0]  %s2253_s22, 128, %s3283_s9, [#allocation4]   ;;  %v2614_v45 = vpop.f32.mrf.mxu1 }
 0x43d   :  { %3119 = dma.done.wait [#allocation4], 128  }
 0x43e   :  { %3120 = vsyncadd [#allocation4], 4294967168 }
 0x43f   :  { %2259 = vsyncpa [#allocation3], 1 }
 0x440   :  { %2260 = vsyncpa [#allocation6], 1 }
 0x441   :  { %2261 = vsyncpa [#allocation9], 1 }
 0x442   :  { %2262 = vsyncpa [#allocation12], 1 }
 0x443   :  { %2263 = vsyncpa [#allocation4], 1 }

</bundles_post_ra>
